<compile_context>
chip_gen: v7x
topology: tpu7x:2x2x1
jax: 0.10.0
libtpu: 0.0.40
codegen_flags: <defaults>
</compile_context>

<pallas_src>
import functools

import jax
import jax.numpy as jnp
from jax import lax
from jax.experimental import pallas as pl
from jax.experimental.pallas import tpu as pltpu


def _round_up(x: int, m: int) -> int:
    return ((x + m - 1) // m) * m


def _fused_mlp_kernel(*refs, n_layers: int):
    """refs = (x_ref, w0_ref, b0_ref, ..., w{L-1}_ref, b{L-1}_ref, o_ref)."""
    x_ref = refs[0]
    o_ref = refs[-1]
    h = x_ref[...]
    for i in range(n_layers):
        w = refs[1 + 2 * i][...]          # (din_i, dout_i), VMEM-resident
        b = refs[2 + 2 * i][...]          # (1, dout_i) -> broadcasts over rows
        h = jnp.dot(h, w, preferred_element_type=jnp.float32,
                    precision=lax.Precision.HIGHEST) + b
        if i < n_layers - 1:
            h = jnp.maximum(h, 0.0)
    o_ref[...] = h.astype(o_ref.dtype)


def uav_classifier_forward(x, params, *, tb: int = 4096):
    """Fused forward pass of UAVClassifier as one pallas_call.

    x: (B, Din) f32; params: list of (w: (din, dout), b: (1, dout)) f32.
    Returns logits (B, output_dim) f32.
    """
    B, Din = x.shape
    out_dim = params[-1][0].shape[1]
    n_layers = len(params)

    # --- Batch tile: multiple of 8 sublanes, large to amortize per-step DMA
    # overhead; keep >= 2 grid steps when the batch allows it so both
    # TensorCores get work on v7x (no-op on v5e/v6e, 1 TC). ---
    TB = min(_round_up(tb, 8), _round_up(B, 8))
    if B >= 1024 and pl.cdiv(B, TB) < 2:
        TB = _round_up(pl.cdiv(B, 2), 8)
    grid = (pl.cdiv(B, TB),)

    # --- BlockSpecs: x / out tiled over batch; weights & biases resident
    # (constant block index -> stay in VMEM after the first step). Last dims
    # of every block equal the full array dims, so no (8,128) padding needed.
    in_specs = [pl.BlockSpec((TB, Din), lambda i: (i, 0))]
    flat_inputs = [x]
    for w, b in params:
        din, dout = w.shape
        in_specs.append(pl.BlockSpec((din, dout), lambda i: (0, 0)))
        in_specs.append(pl.BlockSpec((1, dout), lambda i: (0, 0)))
        flat_inputs.extend([w, b])
    out_spec = pl.BlockSpec((TB, out_dim), lambda i: (i, 0))

    # --- Advisory cost estimate for the XLA scheduler. ---
    dims = [Din] + [w.shape[1] for w, _ in params]
    flops = 2 * B * sum(dims[i] * dims[i + 1] for i in range(n_layers))
    param_bytes = sum(w.size * w.dtype.itemsize + b.size * b.dtype.itemsize
                      for w, b in params)
    bytes_accessed = B * (Din + out_dim) * 4 + param_bytes
    cost = pl.CostEstimate(flops=flops, transcendentals=0,
                           bytes_accessed=bytes_accessed)

    out = pl.pallas_call(
        functools.partial(_fused_mlp_kernel, n_layers=n_layers),
        out_shape=jax.ShapeDtypeStruct((B, out_dim), jnp.float32),
        grid=grid,
        in_specs=in_specs,
        out_specs=out_spec,
        cost_estimate=cost,
        compiler_params=pltpu.CompilerParams(
            dimension_semantics=("parallel",)),   # shard batch tiles across TCs
    )(*flat_inputs)

    return out


def init_params(key, input_dim, output_dim, hidden_layers):
    """Deterministic init matching UAVClassifier layer shapes.

    PyTorch nn.Linear(in, out) has W (out, in), b (out,). We store W
    transposed as (in, out) so the kernel computes x @ W + b.
    """
    dims = [input_dim] + list(hidden_layers) + [output_dim]
    params = []
    for i in range(len(dims) - 1):
        fan_in, fan_out = dims[i], dims[i + 1]
        key, kw, kb = jax.random.split(key, 3)
        bound = 1.0 / jnp.sqrt(fan_in)
        w = jax.random.uniform(kw, (fan_in, fan_out), jnp.float32, -bound, bound)
        b = jax.random.uniform(kb, (1, fan_out), jnp.float32, -bound, bound)
        params.append((w, b))
    return params


if __name__ == "__main__":
    # Small shapes consistent with the module's forward: x is (batch, input_dim).
    batch = 8
    input_dim = 16
    hidden_layers = [32, 32]
    output_dim = 4

    key = jax.random.PRNGKey(0)
    key, kx = jax.random.split(key)
    x = jax.random.normal(kx, (batch, input_dim), dtype=jnp.float32)

    params = init_params(key, input_dim, output_dim, hidden_layers)

    out = uav_classifier_forward(x, params)
    out = jax.block_until_ready(out)

    # Sanity check against plain-JAX reference of the same forward pass.
    ref = x
    for i, (w, b) in enumerate(params):
        ref = jnp.dot(ref, w, precision=lax.Precision.HIGHEST) + b
        if i < len(params) - 1:
            ref = jnp.maximum(ref, 0.0)
    assert out.shape == (batch, output_dim)
    assert jnp.allclose(out, ref, atol=1e-5, rtol=1e-5)

    print("KERNEL_OK")
</pallas_src>

<mosaic_0001>
module attributes {stable_mosaic.version = 11 : i64} {
  func.func @_fused_mlp_kernel(%arg0: i32, %arg1: memref<8x16xf32, #tpu.memory_space<vmem>>, %arg2: memref<16x32xf32, #tpu.memory_space<vmem>>, %arg3: memref<1x32xf32, #tpu.memory_space<vmem>>, %arg4: memref<32x32xf32, #tpu.memory_space<vmem>>, %arg5: memref<1x32xf32, #tpu.memory_space<vmem>>, %arg6: memref<32x4xf32, #tpu.memory_space<vmem>>, %arg7: memref<1x4xf32, #tpu.memory_space<vmem>>, %arg8: memref<8x4xf32, #tpu.memory_space<vmem>>) attributes {dimension_semantics = [#tpu.dimension_semantics<parallel>], iteration_bounds = array<i64: 1>, scalar_prefetch = 0 : i64, scratch_operands = 0 : i64, tpu.core_type = #tpu.core_type<tc>, window_params = [{transform_indices = @transform_0, window_bounds = array<i64: 8, 16>}, {pipeline_mode = #tpu.pipeline_mode<synchronous>, transform_indices = @transform_1, window_bounds = array<i64: 16, 32>}, {pipeline_mode = #tpu.pipeline_mode<synchronous>, transform_indices = @transform_2, window_bounds = array<i64: 1, 32>}, {pipeline_mode = #tpu.pipeline_mode<synchronous>, transform_indices = @transform_3, window_bounds = array<i64: 32, 32>}, {pipeline_mode = #tpu.pipeline_mode<synchronous>, transform_indices = @transform_4, window_bounds = array<i64: 1, 32>}, {pipeline_mode = #tpu.pipeline_mode<synchronous>, transform_indices = @transform_5, window_bounds = array<i64: 32, 4>}, {pipeline_mode = #tpu.pipeline_mode<synchronous>, transform_indices = @transform_6, window_bounds = array<i64: 1, 4>}, {transform_indices = @transform_7, window_bounds = array<i64: 8, 4>}]} {
    %c0 = arith.constant 0 : index
    %c0_0 = arith.constant 0 : index
    %0 = vector.load %arg1[%c0, %c0_0] : memref<8x16xf32, #tpu.memory_space<vmem>>, vector<8x16xf32>
    %c0_1 = arith.constant 0 : index
    %c0_2 = arith.constant 0 : index
    %1 = vector.load %arg2[%c0_1, %c0_2] : memref<16x32xf32, #tpu.memory_space<vmem>>, vector<16x32xf32>
    %c0_3 = arith.constant 0 : index
    %c0_4 = arith.constant 0 : index
    %2 = vector.load %arg3[%c0_3, %c0_4] : memref<1x32xf32, #tpu.memory_space<vmem>>, vector<1x32xf32>
    %cst = arith.constant dense<0.000000e+00> : vector<8x32xf32>
    %3 = tpu.matmul %0, %1, %cst {dimension_numbers = #tpu.dot_dimension_numbers<[1], [0], [0], [1], [0, 0, 1, 1], [], []>, precision = #tpu.contract_precision<fp32>} : vector<8x16xf32>, vector<16x32xf32>, vector<8x32xf32> -> vector<8x32xf32>
    %4 = vector.broadcast %2 : vector<1x32xf32> to vector<8x32xf32>
    %5 = arith.addf %3, %4 : vector<8x32xf32>
    %cst_5 = arith.constant 0.000000e+00 : f32
    %6 = vector.broadcast %cst_5 : f32 to vector<8x32xf32>
    %7 = arith.maximumf %5, %6 : vector<8x32xf32>
    %c0_6 = arith.constant 0 : index
    %c0_7 = arith.constant 0 : index
    %8 = vector.load %arg4[%c0_6, %c0_7] : memref<32x32xf32, #tpu.memory_space<vmem>>, vector<32x32xf32>
    %c0_8 = arith.constant 0 : index
    %c0_9 = arith.constant 0 : index
    %9 = vector.load %arg5[%c0_8, %c0_9] : memref<1x32xf32, #tpu.memory_space<vmem>>, vector<1x32xf32>
    %cst_10 = arith.constant dense<0.000000e+00> : vector<8x32xf32>
    %10 = tpu.matmul %7, %8, %cst_10 {dimension_numbers = #tpu.dot_dimension_numbers<[1], [0], [0], [1], [0, 0, 1, 1], [], []>, precision = #tpu.contract_precision<fp32>} : vector<8x32xf32>, vector<32x32xf32>, vector<8x32xf32> -> vector<8x32xf32>
    %11 = vector.broadcast %9 : vector<1x32xf32> to vector<8x32xf32>
    %12 = arith.addf %10, %11 : vector<8x32xf32>
    %cst_11 = arith.constant 0.000000e+00 : f32
    %13 = vector.broadcast %cst_11 : f32 to vector<8x32xf32>
    %14 = arith.maximumf %12, %13 : vector<8x32xf32>
    %c0_12 = arith.constant 0 : index
    %c0_13 = arith.constant 0 : index
    %15 = vector.load %arg6[%c0_12, %c0_13] : memref<32x4xf32, #tpu.memory_space<vmem>>, vector<32x4xf32>
    %c0_14 = arith.constant 0 : index
    %c0_15 = arith.constant 0 : index
    %16 = vector.load %arg7[%c0_14, %c0_15] : memref<1x4xf32, #tpu.memory_space<vmem>>, vector<1x4xf32>
    %cst_16 = arith.constant dense<0.000000e+00> : vector<8x4xf32>
    %17 = tpu.matmul %14, %15, %cst_16 {dimension_numbers = #tpu.dot_dimension_numbers<[1], [0], [0], [1], [0, 0, 1, 1], [], []>, precision = #tpu.contract_precision<fp32>} : vector<8x32xf32>, vector<32x4xf32>, vector<8x4xf32> -> vector<8x4xf32>
    %18 = vector.broadcast %16 : vector<1x4xf32> to vector<8x4xf32>
    %19 = arith.addf %17, %18 : vector<8x4xf32>
    %c0_17 = arith.constant 0 : index
    %c0_18 = arith.constant 0 : index
    %20 = vector.load %arg8[%c0_17, %c0_18] : memref<8x4xf32, #tpu.memory_space<vmem>>, vector<8x4xf32>
    tpu.vector_store %arg8[%c0_17, %c0_18], %19 {strides = array<i32>} : memref<8x4xf32, #tpu.memory_space<vmem>>, vector<8x4xf32>,
    return
  }
  func.func @transform_0(%arg0: i32) -> (i32, i32) {
    %c0_i32 = arith.constant 0 : i32
    %c0_i32_0 = arith.constant 0 : i32
    return %arg0, %c0_i32 : i32, i32
  }
  func.func @transform_1(%arg0: i32) -> (i32, i32) {
    %c0_i32 = arith.constant 0 : i32
    %c0_i32_0 = arith.constant 0 : i32
    %c0_i32_1 = arith.constant 0 : i32
    return %c0_i32, %c0_i32_0 : i32, i32
  }
  func.func @transform_2(%arg0: i32) -> (i32, i32) {
    %c0_i32 = arith.constant 0 : i32
    %c0_i32_0 = arith.constant 0 : i32
    %c0_i32_1 = arith.constant 0 : i32
    return %c0_i32, %c0_i32_0 : i32, i32
  }
  func.func @transform_3(%arg0: i32) -> (i32, i32) {
    %c0_i32 = arith.constant 0 : i32
    %c0_i32_0 = arith.constant 0 : i32
    %c0_i32_1 = arith.constant 0 : i32
    return %c0_i32, %c0_i32_0 : i32, i32
  }
  func.func @transform_4(%arg0: i32) -> (i32, i32) {
    %c0_i32 = arith.constant 0 : i32
    %c0_i32_0 = arith.constant 0 : i32
    %c0_i32_1 = arith.constant 0 : i32
    return %c0_i32, %c0_i32_0 : i32, i32
  }
  func.func @transform_5(%arg0: i32) -> (i32, i32) {
    %c0_i32 = arith.constant 0 : i32
    %c0_i32_0 = arith.constant 0 : i32
    %c0_i32_1 = arith.constant 0 : i32
    return %c0_i32, %c0_i32_0 : i32, i32
  }
  func.func @transform_6(%arg0: i32) -> (i32, i32) {
    %c0_i32 = arith.constant 0 : i32
    %c0_i32_0 = arith.constant 0 : i32
    %c0_i32_1 = arith.constant 0 : i32
    return %c0_i32, %c0_i32_0 : i32, i32
  }
  func.func @transform_7(%arg0: i32) -> (i32, i32) {
    %c0_i32 = arith.constant 0 : i32
    %c0_i32_0 = arith.constant 0 : i32
    return %arg0, %c0_i32 : i32, i32
  }
}

</mosaic_0001>

<bundles_post_ra>
// kernel: tpu_custom_call.1
= control target key start
LH: loop header
LB: loop body
LE: loop exit
PB: predicated region body
PF: predicated region fallthrough
CT: control target
= control target key end

     0   :  { %12 = vsyncpa [#allocation3], 0  ;;  %s1927_s24 = smov [#allocation2]   ;;  %s2102_s0 = inlined_call_operand.vmem [shape: f32[8,16], index: 0, kind: input, shape index: {}]   ;;  %s2103_s1 = inlined_call_operand.hbm [shape: f32[16,32], index: 1, kind: input, shape index: {}]   ;;  %s2104_s2 = inlined_call_operand.vmem [shape: f32[1,32], index: 2, kind: input, shape index: {}]   ;;  %s2105_s3 = inlined_call_operand.vmem [shape: f32[32,32], index: 3, kind: input, shape index: {}]   ;;  %s2106_s4 = inlined_call_operand.vmem [shape: f32[1,32], index: 4, kind: input, shape index: {}]   ;;  %s2107_s5 = inlined_call_operand.vmem [shape: f32[32,4], index: 5, kind: input, shape index: {}]   ;;  %s2108_s6 = inlined_call_operand.vmem [shape: f32[1,4], index: 6, kind: input, shape index: {}]   ;;  %s2109_s7 = inlined_call_operand.vmem [shape: f32[8,4], index: 7, kind: output, shape index: {}]  }
   0x1   :  { %s20_s25 = sshll.u32 %s1927_s24, 4  ;;  %s1903_s28 = scalar_lea.hbm %s2103_s1, 256  ;;  %s21_s25 = int_to_ptr.vmem [resolvable:$true] %s20_s25 }
   0x2   :  { %p1904_p0 = scmp.ne.s32.totalorder %s2103_s1, %s1903_s28  ;;  %p1907_p1 = scmp.lt.u32.totalorder %s1903_s28, %s2103_s1 }
   0x4   :  { %p1909_p2 = pnand %p1907_p1, %p1904_p0 }
   0x6   :  { %1912 = shalt.err (!%p1909_p2)
}
   0x7   :  { %s1913_s10 = scalar_lea.vmem %s21_s25, 256  ;;  %p1918_p4 = scmp.lt.s32.totalorder %s21_s25, %s21_s25 }
   0x8   :  { %p1914_p3 = scmp.ne.s32.totalorder %s21_s25, %s1913_s10  ;;  %p1919_p5 = scmp.lt.s32.totalorder %s1913_s10, %s1913_s10 }
   0xa   :  { %p1920_p6 = por %p1919_p5, %p1918_p4 }
   0xc   :  { %p1921_p7 = pnand %p1920_p6, %p1914_p3 }
   0xe   :  { %1924 = shalt.err (!%p1921_p7)
}
   0xf   :  { %s1928_s11 = smov 128   ;;  %s1929_s12 = smov 8  }
  0x10   :  { %26 = dma.hbm_to_vmem [thread:$0]  %s2103_s1, 256, %s21_s25, [#allocation3], %s1928_s11, %s1928_s11, %s1929_s12  }
  0x11   :  { %1925 = dma.done.wait [#allocation3], 256  }
  0x12   :  { %1926 = vsyncadd [#allocation3], 4294967040  ;;  %v1930_v0 = vmov 0.0|0.0   ;;  %vm1931_vm0 = vmmov 0   ;;  %v1932_v1 = vmov 0.0   ;;  %vm50_vm1 = vcmask 130048  }
  0x13   :  { %1779 = vmatprep.subr.bf16.mxu0 %v1930_v0  ;;  %1613 = vmatprep.mubr.msk.f32.mxu0 %vm1931_vm0, %v1932_v1  ;;  %v41_v2 = vld [vmem:[#allocation2] sm:$0xff]  ;;  %v42_v3 = vld [vmem:[#allocation2 + $0x8] sm:$0xff]  ;;  %v516_v32 = vld [vmem:[%s2105_s3 + $0x10] sm:$0xff]  ;;  %vm525_vm2 = vcmask 261120   ;;  %vm1514_vm3 = vcmask 31744  }
  0x14   :  { %1776 = vmatprep.subr.bf16.mxu1 %v1930_v0  ;;  %1606 = vmatprep.mubr.msk.f32.mxu1 %vm1931_vm0, %v1932_v1  ;;  %v40_v4 = vld [vmem:[%s2102_s0] sm:$0xff]  ;;  %v55_v5 = vand.u32 4294901760, %v41_v2  ;;  %v58_v6 = vand.u32 4294901760, %v42_v3  ;;  %v515_v26 = vld [vmem:[%s2105_s3 + $0x8] sm:$0xff]  ;;  %v517_v33 = vld [vmem:[%s2105_s3 + $0x18] sm:$0xff]  ;;  %v536_v34 = vand.u32 4294901760, %v516_v32 }
  0x15   :  { %v52_v7 = vsel %vm50_vm1, %v40_v4, 0  ;;  %v514_v25 = vld [vmem:[%s2105_s3] sm:$0xff]  ;;  %v533_v28 = vand.u32 4294901760, %v515_v26  ;;  %v539_v35 = vand.u32 4294901760, %v517_v33 }
  0x16   :  { %v121_v8 = vand.u32 4294901760, %v52_v7  ;;  %v133_v9 = vsub.f32 %v41_v2, %v55_v5  ;;  %v140_v10 = vsub.f32 %v42_v3, %v58_v6  ;;  %v1777_v11 = vpack.c.bf16 %v58_v6, %v55_v5  ;;  %v1521_v59 = vld [vmem:[%s2104_s2] ss:$0 sm:$0xff] }
  0x17   :  { %v530_v27 = vand.u32 4294901760, %v514_v25  ;;  %v617_v31 = vsub.f32 %v515_v26, %v533_v28  ;;  %v2028_v38 = vpack.c.bf16 %v539_v35, %v536_v34  ;;  %v624_v39 = vsub.f32 %v516_v32, %v536_v34 }
  0x18   :  { %v122_v12 = vsub.f32 %v52_v7, %v121_v8  ;;  %v134_v13 = vand.u32 4294901760, %v133_v9  ;;  %v141_v14 = vand.u32 4294901760, %v140_v10  ;;  %1778 = vmatpush3.bf16.msra.mxu1 %v1777_v11  ;;  %v1783_v23 = vpack.c.bf16 %v140_v10, %v133_v9 }
  0x19   :  { %1794 = vmatprep.subr.bf16.mxu1 %v1930_v0  ;;  %v2018_v29 = vpack.c.bf16 %v533_v28, %v530_v27  ;;  %v610_v30 = vsub.f32 %v514_v25, %v530_v27  ;;  %v618_v37 = vand.u32 4294901760, %v617_v31  ;;  %v631_v40 = vsub.f32 %v517_v33, %v539_v35 }
  0x1a   :  { %v123_v15 = vand.u32 4294901760, %v122_v12  ;;  %v135_v16 = vsub.f32 %v133_v9, %v134_v13  ;;  %v142_v17 = vsub.f32 %v140_v10, %v141_v14  ;;  %v1789_v24 = vpack.c.bf16 %v141_v14, %v134_v13  ;;  %v1015_v9 = vld [vmem:[%s2107_s5] sm:$0xff]  ;;  %v1016_v10 = vld [vmem:[%s2107_s5 + $0x8] sm:$0xff] }
  0x1b   :  { %v611_v36 = vand.u32 4294901760, %v610_v30  ;;  %v619_v42 = vsub.f32 %v617_v31, %v618_v37  ;;  %v625_v44 = vand.u32 4294901760, %v624_v39  ;;  %v632_v45 = vand.u32 4294901760, %v631_v40 }
  0x1c   :  { %v124_v18 = vsub.f32 %v122_v12, %v123_v15  ;;  %v136_v19 = vand.u32 4294901760, %v135_v16  ;;  %v143_v20 = vand.u32 4294901760, %v142_v17  ;;  %v1807_v53 = vpack.c.bf16 %v617_v31, %v610_v30  ;;  %v1018_v16 = vld [vmem:[%s2107_s5 + $0x18] sm:$0xff] }
  0x1d   :  { %v612_v41 = vsub.f32 %v610_v30, %v611_v36  ;;  %v620_v46 = vand.u32 4294901760, %v619_v42  ;;  %v626_v47 = vsub.f32 %v624_v39, %v625_v44  ;;  %v633_v48 = vsub.f32 %v631_v40, %v632_v45 }
  0x1e   :  { %v125_v21 = vand.u32 4294901760, %v124_v18  ;;  %v1780_v22 = vpack.c.bf16 %v143_v20, %v136_v19  ;;  %v1810_v54 = vpack.c.bf16 %v631_v40, %v624_v39  ;;  %v1819_v55 = vpack.c.bf16 %v618_v37, %v611_v36 }
  0x1f   :  { %v613_v43 = vand.u32 4294901760, %v612_v41  ;;  %v627_v50 = vand.u32 4294901760, %v626_v47  ;;  %v634_v51 = vand.u32 4294901760, %v633_v48  ;;  %v1822_v56 = vpack.c.bf16 %v632_v45, %v625_v44  ;;  %v1522_v41 = vld [vmem:[%s2106_s4] ss:$0 sm:$0xff] }
  0x20   :  { %1607 = vmatmul.mubr.f32.vlgmr.msra.gmra.mrb[0].mxu1 %v125_v21  ;;  %1781 = vmatpush3.bf16.msra.mxu0 %v1780_v22  ;;  %v1039_v20 = vand.u32 4294901760, %v1018_v16 }
  0x21   :  { %1652 = vmatprep.mubr.msk.f32.mxu1 %vm1931_vm0, %v1932_v1  ;;  %1782 = vmatprep.subr.bf16.mxu0 %v1930_v0  ;;  %v1801_v49 = vpack.c.bf16 %v620_v46, %v613_v43  ;;  %v1804_v52 = vpack.c.bf16 %v634_v51, %v627_v50 }
  0x22   :  { %1796 = vmatpush3.bf16.msra.mxu1 %v2018_v29 }
  0x23   :  { %1614 = vmatmul.mubr.f32.vlgmr.msra.gmra.mrb[0].mxu0 %v121_v8  ;;  %1797 = vmatprep.subr.bf16.mxu1 %v1930_v0 }
  0x24   :  { %1784 = vmatpush3.bf16.msra.mxu0 %v1783_v23  ;;  %1620 = vmatprep.mubr.msk.f32.mxu0 %vm1931_vm0, %v1932_v1 }
  0x25   :  { %1785 = vmatprep.subr.bf16.mxu0 %v1930_v0 }
  0x26   :  { %1799 = vmatpush3.bf16.msra.mxu1 %v2028_v38 }
  0x27   :  { %1800 = vmatprep.subr.bf16.mxu1 %v1930_v0 }
  0x2b   :  { %1621 = vmatmul.mubr.f32.vlgmr.msra.gmra.mrb[0].mxu0 %v122_v12  ;;  %v1033_v12 = vand.u32 4294901760, %v1016_v10 }
  0x2c   :  { %1787 = vmatpush3.bf16.msra.mxu0 %v1777_v11  ;;  %1627 = vmatprep.mubr.msk.f32.mxu0 %vm1931_vm0, %v1932_v1 }
  0x2d   :  { %1788 = vmatprep.subr.bf16.mxu0 %v1930_v0  ;;  %v1117_v14 = vsub.f32 %v1016_v10, %v1033_v12 }
  0x2f   :  { %v1118_v18 = vand.u32 4294901760, %v1117_v14 }
  0x31   :  { %v1119_v22 = vsub.f32 %v1117_v14, %v1118_v18 }
  0x33   :  { %1628 = vmatmul.mubr.f32.vlgmr.msra.gmra.mrb[0].mxu0 %v123_v15  ;;  %v1017_v15 = vld [vmem:[%s2107_s5 + $0x10] sm:$0xff]  ;;  %v1120_v26 = vand.u32 4294901760, %v1119_v22 }
  0x34   :  { %1790 = vmatpush3.bf16.msra.mxu0 %v1789_v24  ;;  %1634 = vmatprep.mubr.msk.f32.mxu0 %vm1931_vm0, %v1932_v1  ;;  %v1036_v19 = vand.u32 4294901760, %v1017_v15  ;;  %v1131_v24 = vsub.f32 %v1018_v16, %v1039_v20 }
  0x35   :  { %1791 = vmatprep.subr.bf16.mxu0 %v1930_v0 }
  0x36   :  { %v1124_v23 = vsub.f32 %v1017_v15, %v1036_v19  ;;  %v1132_v28 = vand.u32 4294901760, %v1131_v24  ;;  %v1834_v37 = vpack.c.bf16 %v1039_v20, %v1036_v19 }
  0x38   :  { %v1125_v27 = vand.u32 4294901760, %v1124_v23  ;;  %v1133_v31 = vsub.f32 %v1131_v24, %v1132_v28 }
  0x3a   :  { %v1126_v30 = vsub.f32 %v1124_v23, %v1125_v27  ;;  %v1134_v33 = vand.u32 4294901760, %v1133_v31  ;;  %v1858_v40 = vpack.c.bf16 %v1132_v28, %v1125_v27 }
  0x3b   :  { %1635 = vmatmul.mubr.f32.vlgmr.msra.gmra.mrb[0].mxu0 %v121_v8 }
  0x3c   :  { %1793 = vmatpush3.bf16.msra.mxu0 %v1777_v11  ;;  %1641 = vmatprep.mubr.msk.f32.mxu0 %vm1931_vm0, %v1932_v1  ;;  %v1030_v11 = vand.u32 4294901760, %v1015_v9  ;;  %v1127_v32 = vand.u32 4294901760, %v1126_v30 }
  0x3d   :  { %1836 = vmatprep.subr.bf16.mxu0 %v1930_v0 }
  0x3e   :  { %v1110_v13 = vsub.f32 %v1015_v9, %v1030_v11  ;;  %v1840_v34 = vpack.c.bf16 %v1134_v33, %v1127_v32  ;;  %v1831_v35 = vpack.c.bf16 %v1033_v12, %v1030_v11 }
  0x40   :  { %v1111_v17 = vand.u32 4294901760, %v1110_v13  ;;  %v1843_v36 = vpack.c.bf16 %v1117_v14, %v1110_v13 }
  0x42   :  { %v1112_v21 = vsub.f32 %v1110_v13, %v1111_v17  ;;  %v1855_v39 = vpack.c.bf16 %v1118_v18, %v1111_v17 }
  0x43   :  { %1642 = vmatmul.mubr.f32.vlgmr.msra.gmra.mrb[0].mxu0 %v121_v8 }
  0x44   :  { %1729 = vmatprep.mubr.msk.f32.mxu0 %vm1931_vm0, %v1932_v1  ;;  %v1113_v25 = vand.u32 4294901760, %v1112_v21 }
  0xf3   :  { %v127_v57 = vpop.f32.mrb[0].mxu1 }
  0xf4   :  { %v1608_v58 = vpop.f32.mrb[1].mxu1  ;;  %v128_v60 = vadd.f32 %v1521_v59, %v127_v57 }
 0x116   :  { %v509_v61 = vpop.f32.mrb[0].mxu0 }
 0x117   :  { %v1867_v62 = vadd.f32 %v509_v61, %v128_v60  ;;  %v1643_v63 = vpop.f32.mrb[1].mxu0 }
 0x119   :  { %v513_v2 = vmax.f32 %v1867_v62, 0.0 }
 0x11b   :  { %v527_v3 = vsel %vm525_vm2, %v513_v2, 0 }
 0x11c   :  { %v598_v4 = vand.u32 4294901760, %v527_v3 }
 0x11e   :  { %v599_v5 = vsub.f32 %v527_v3, %v598_v4 }
 0x120   :  { %v600_v6 = vand.u32 4294901760, %v599_v5 }
 0x122   :  { %v601_v7 = vsub.f32 %v599_v5, %v600_v6 }
 0x124   :  { %v602_v8 = vand.u32 4294901760, %v601_v7 }
 0x126   :  { %1653 = vmatmul.mubr.f32.vlgmr.msra.gmra.mrb[2].mxu1 %v602_v8 }
 0x127   :  { %1802 = vmatpush3.bf16.msra.mxu1 %v1801_v49  ;;  %1663 = vmatprep.mubr.msk.f32.mxu1 %vm1931_vm0, %v1932_v1 }
 0x128   :  { %1803 = vmatprep.subr.bf16.mxu1 %v1930_v0 }
 0x12b   :  { %1805 = vmatpush3.bf16.msra.mxu1 %v1804_v52 }
 0x12c   :  { %1806 = vmatprep.subr.bf16.mxu1 %v1930_v0 }
 0x12e   :  { %1664 = vmatmul.mubr.f32.vlgmr.msra.gmra.mrb[2].mxu1 %v598_v4 }
 0x12f   :  { %1808 = vmatpush3.bf16.msra.mxu1 %v1807_v53  ;;  %1674 = vmatprep.mubr.msk.f32.mxu1 %vm1931_vm0, %v1932_v1 }
 0x130   :  { %1809 = vmatprep.subr.bf16.mxu1 %v1930_v0 }
 0x133   :  { %1811 = vmatpush3.bf16.msra.mxu1 %v1810_v54  ;;  %v1523_v54 = vld [vmem:[%s2108_s6] ss:$0 sm:$0xff] }
 0x134   :  { %1812 = vmatprep.subr.bf16.mxu1 %v1930_v0 }
 0x136   :  { %1675 = vmatmul.mubr.f32.vlgmr.msra.gmra.mrb[2].mxu1 %v599_v5 }
 0x137   :  { %1814 = vmatpush3.bf16.msra.mxu1 %v2018_v29  ;;  %1685 = vmatprep.mubr.msk.f32.mxu1 %vm1931_vm0, %v1932_v1 }
 0x138   :  { %1815 = vmatprep.subr.bf16.mxu1 %v1930_v0 }
 0x13b   :  { %1817 = vmatpush3.bf16.msra.mxu1 %v2028_v38 }
 0x13c   :  { %1818 = vmatprep.subr.bf16.mxu1 %v1930_v0 }
 0x13e   :  { %1686 = vmatmul.mubr.f32.vlgmr.msra.gmra.mrb[2].mxu1 %v600_v6 }
 0x13f   :  { %1820 = vmatpush3.bf16.msra.mxu1 %v1819_v55  ;;  %1696 = vmatprep.mubr.msk.f32.mxu1 %vm1931_vm0, %v1932_v1 }
 0x140   :  { %1821 = vmatprep.subr.bf16.mxu1 %v1930_v0 }
 0x143   :  { %1823 = vmatpush3.bf16.msra.mxu1 %v1822_v56 }
 0x144   :  { %1824 = vmatprep.subr.bf16.mxu1 %v1930_v0 }
 0x146   :  { %1697 = vmatmul.mubr.f32.vlgmr.msra.gmra.mrb[2].mxu1 %v598_v4 }
 0x147   :  { %1826 = vmatpush3.bf16.msra.mxu1 %v2018_v29  ;;  %1707 = vmatprep.mubr.msk.f32.mxu1 %vm1931_vm0, %v1932_v1  ;;  %v1837_v29 = vpack.c.bf16 %v1120_v26, %v1113_v25 }
 0x148   :  { %1827 = vmatprep.subr.bf16.mxu1 %v1930_v0 }
 0x149   :  { %1838 = vmatpush3.bf16.msra.mxu0 %v1837_v29 }
 0x14a   :  { %1839 = vmatprep.subr.bf16.mxu0 %v1930_v0 }
 0x14b   :  { %1829 = vmatpush3.bf16.msra.mxu1 %v2028_v38  ;;  %v1846_v38 = vpack.c.bf16 %v1131_v24, %v1124_v23 }
 0x14c   :  { %1830 = vmatprep.subr.bf16.mxu1 %v1930_v0 }
 0x14d   :  { %1841 = vmatpush3.bf16.msra.mxu0 %v1840_v34 }
 0x14e   :  { %1708 = vmatmul.mubr.f32.vlgmr.msra.gmra.mrb[2].mxu1 %v598_v4  ;;  %1842 = vmatprep.subr.bf16.mxu0 %v1930_v0 }
 0x14f   :  { %1718 = vmatprep.mubr.msk.f32.mxu1 %vm1931_vm0, %v1932_v1  ;;  %1832 = vmatpush3.bf16.msra.mxu1 %v1831_v35 }
 0x150   :  { %1833 = vmatprep.subr.bf16.mxu1 %v1930_v0 }
 0x153   :  { %1835 = vmatpush3.bf16.msra.mxu1 %v1834_v37 }
 0x221   :  { %v1010_v42 = vpop.f32.mrb[2].mxu1 }
 0x222   :  { %v1868_v43 = vadd.f32 %v1522_v41, %v1010_v42  ;;  %v1709_v44 = vpop.f32.mrb[3].mxu1 }
 0x224   :  { %v1014_v45 = vmax.f32 %v1868_v43, 0.0 }
 0x226   :  { %v1027_v46 = vsel %vm525_vm2, %v1014_v45, 0 }
 0x227   :  { %v1098_v47 = vand.u32 4294901760, %v1027_v46 }
 0x229   :  { %v1099_v48 = vsub.f32 %v1027_v46, %v1098_v47  ;;  %1730 = vmatmul.mubr.f32.vlgmr.msra.gmra.mrb[2].mxu0 %v1098_v47 }
 0x22a   :  { %1844 = vmatpush3.bf16.msra.mxu0 %v1843_v36  ;;  %1740 = vmatprep.mubr.msk.f32.mxu0 %vm1931_vm0, %v1932_v1 }
 0x22b   :  { %v1100_v49 = vand.u32 4294901760, %v1099_v48  ;;  %1845 = vmatprep.subr.bf16.mxu0 %v1930_v0 }
 0x22d   :  { %v1101_v50 = vsub.f32 %v1099_v48, %v1100_v49 }
 0x22e   :  { %1847 = vmatpush3.bf16.msra.mxu0 %v1846_v38 }
 0x22f   :  { %v1102_v51 = vand.u32 4294901760, %v1101_v50  ;;  %1848 = vmatprep.subr.bf16.mxu0 %v1930_v0 }
 0x231   :  { %1719 = vmatmul.mubr.f32.vlgmr.msra.gmra.mrb[4].mxu1 %v1102_v51  ;;  %1741 = vmatmul.mubr.f32.vlgmr.msra.gmra.mrb[2].mxu0 %v1099_v48 }
 0x232   :  { %1850 = vmatpush3.bf16.msra.mxu0 %v1831_v35  ;;  %1751 = vmatprep.mubr.msk.f32.mxu0 %vm1931_vm0, %v1932_v1 }
 0x233   :  { %1851 = vmatprep.subr.bf16.mxu0 %v1930_v0 }
 0x236   :  { %1853 = vmatpush3.bf16.msra.mxu0 %v1834_v37 }
 0x237   :  { %1854 = vmatprep.subr.bf16.mxu0 %v1930_v0 }
 0x239   :  { %1752 = vmatmul.mubr.f32.vlgmr.msra.gmra.mrb[2].mxu0 %v1100_v49 }
 0x23a   :  { %1856 = vmatpush3.bf16.msra.mxu0 %v1855_v39  ;;  %1762 = vmatprep.mubr.msk.f32.mxu0 %vm1931_vm0, %v1932_v1 }
 0x23b   :  { %1857 = vmatprep.subr.bf16.mxu0 %v1930_v0 }
 0x23e   :  { %1859 = vmatpush3.bf16.msra.mxu0 %v1858_v40 }
 0x23f   :  { %1860 = vmatprep.subr.bf16.mxu0 %v1930_v0 }
 0x241   :  { %1763 = vmatmul.mubr.f32.vlgmr.msra.gmra.mrb[2].mxu0 %v1098_v47 }
 0x242   :  { %1862 = vmatpush3.bf16.msra.mxu0 %v1831_v35  ;;  %1773 = vmatprep.mubr.msk.f32.mxu0 %vm1931_vm0, %v1932_v1 }
 0x243   :  { %1863 = vmatprep.subr.bf16.mxu0 %v1930_v0 }
 0x246   :  { %1865 = vmatpush3.bf16.msra.mxu0 %v1834_v37 }
 0x249   :  { %1774 = vmatmul.mubr.f32.vlgmr.msra.gmra.mrb[2].mxu0 %v1098_v47 }
 0x304   :  { %v1104_v52 = vpop.f32.mrb[4].mxu1 }
 0x305   :  { %v1720_v53 = vpop.f32.mrb[5].mxu1  ;;  %v1105_v55 = vadd.f32 %v1523_v54, %v1104_v52 }
 0x31c   :  { %v1510_v56 = vpop.f32.mrb[2].mxu0 }
 0x31d   :  { %v1870_v57 = vadd.f32 %v1510_v56, %v1105_v55  ;;  %v1775_v58 = vpop.f32.mrb[3].mxu0 }
 0x31f   :  { %1515 = vst.msk [vmem:[%s2109_s7] sm:$0xff] %vm1514_vm3, %v1870_v57 }
 0x320   :  { %1520 = vsyncpa [#allocation3], 1 }

</bundles_post_ra>
